<compile_context>
chip_gen: v5e
topology: v5e:2x2
jax: 0.10.0
libtpu: 0.0.40
codegen_flags: <defaults>
</compile_context>

<pallas_src>
import functools

import numpy as np
import jax
import jax.numpy as jnp
from jax.experimental import pallas as pl
from jax.experimental.pallas import tpu as pltpu

# ---------------- config (mirrors cfg.model.*) ----------------
MAX_SH_DEGREE = 1
SH_DIMS = (MAX_SH_DEGREE + 1) ** 2 - 1           # 3
SPLIT_DIMENSIONS = [3, 1, 3, 4, 3, SH_DIMS * 3]  # [3, 1, 3, 4, 3, 9]
C_TOTAL = sum(SPLIT_DIMENSIONS)                  # 23
C_PAD = 24                                       # pad to a multiple of 8 sublanes
OFFSET_SCALE = 0.1
ISOTROPIC = False                                # cfg.model.isotropic = False
HIDDEN = 32


def gaussian_splat_kernel(pts_ref, w1t_ref, b1_ref, w2t_ref, b2_ref, out_ref,
                          *, n_points):
    """One grid step = tb batch elements, packed along the 128-wide lane axis.

    pts_ref : (8, tb*N)  f32   rows 0-2 = xyz centers (channel-first), rows 3-7 zero pad
    w1t_ref : (H, 3)     f32
    b1_ref  : (H, 1)     f32
    w2t_ref : (C_PAD, H) bf16  (row 23 zero-padded)
    b2_ref  : (C_PAD, 1) f32   (row 23 zero)
    out_ref : (C_PAD, tb*N) f32
    """
    x8 = pts_ref[...]                    # (8, M)
    w1t = w1t_ref[...]                   # (H, 3)
    b1 = b1_ref[...]                     # (H, 1)
    w2t = w2t_ref[...]                   # (C_PAD, H) bf16
    b2 = b2_ref[...]                     # (C_PAD, 1)

    m = x8.shape[-1]                     # tb * N (static)
    tb = m // n_points

    # ---- layer 1 (K=3): three VPU broadcast FMAs over the full batch tile ----
    h = (w1t[:, 0:1] * x8[0:1, :]
         + w1t[:, 1:2] * x8[1:2, :]
         + w1t[:, 2:3] * x8[2:3, :]
         + b1)                                               # (H, M)
    h = jnp.maximum(h, 0.0)                                  # ReLU (f32 on the VPU)

    # ---- layer 2: ONE MXU push for the whole batch tile, bf16 in / f32 acc ----
    feat = jnp.dot(w2t, h.astype(jnp.bfloat16),
                   preferred_element_type=jnp.float32) + b2  # (C_PAD, M) f32

    # ---- rotation_activation = F.normalize(x, dim=-1, eps=1e-6) applied to the
    # channel-first (B, 4, N) tensor (as the reference module does): L2 norm over
    # the POINT axis per channel -> per-128-lane-segment reduction here.
    # Normalize every row per segment (trivial extra work on idle XLU/EUP slots);
    # rows 7:11 are selected below.  max(||.||, 1e-6) == rsqrt(max(sumsq, 1e-12)).
    parts = []
    for b in range(tb):                                      # static, lane-tile-aligned
        seg = feat[:, b * n_points:(b + 1) * n_points]       # (C_PAD, N)
        ssq = jnp.sum(seg * seg, axis=-1, keepdims=True)     # XLU cross-lane reduce
        inv = jax.lax.rsqrt(jnp.maximum(ssq, 1e-12))         # EUP rsqrt
        parts.append(seg * inv)
    rotn = parts[0] if tb == 1 else jnp.concatenate(parts, axis=-1)   # (C_PAD, M)

    # ---- assemble (C_PAD, M) result from two sublane-tile-aligned pieces via VPU
    # selects; one aligned concat; ONE unmasked full-tile store (no vst.msk RMW). ----
    f_lo = feat[0:8, :]                                      # rows 0-7
    f_hi = feat[8:, :]                                       # rows 8-23
    r_lo = jax.lax.broadcasted_iota(jnp.int32, f_lo.shape, 0)
    r_hi = jax.lax.broadcasted_iota(jnp.int32, f_hi.shape, 0)

    piece_lo = jnp.where(
        r_lo < 3, jnp.tanh(f_lo) * OFFSET_SCALE + x8,        # xyz offset + center
        jnp.where(r_lo < 4, jax.nn.sigmoid(f_lo),            # opacity
                  jnp.where(r_lo < 7,
                            jnp.exp(jnp.clip(f_lo, -1.0, 20.0)),   # scaling
                            rotn[0:8, :])))                  # rotation channel 0 (row 7)
    piece_hi = jnp.where(r_hi < 3, rotn[8:, :], f_hi)        # rot ch 1-3 | f_dc/f_rest/pad

    out_ref[...] = jnp.concatenate([piece_lo, piece_hi], axis=0)   # (24, M)


def _num_tensorcores():
    """TensorCores per chip (1 on v5e/v6e, 2 on v7x). Best-effort query."""
    try:
        info = pltpu.get_tpu_info()
        for attr in ("num_cores", "core_count", "num_tensorcores",
                     "tensorcore_count", "cores_per_chip"):
            v = getattr(info, attr, None)
            if isinstance(v, int) and 1 <= v <= 8:
                return v
    except Exception:
        pass
    try:
        if "v7" in jax.devices()[0].device_kind.lower():
            return 2
    except Exception:
        pass
    return 1


def _pick_batch_tile(B, max_tile=64, min_batch_per_core=32):
    """Generation-aware batch tiling.

    - 1-TC chips (v5e/v6e): the grid is a serial loop, each extra step is ~0.35 us
      of pure overhead -> run the whole batch in one step when it fits max_tile.
    - v7x (2 TC): only split the grid across cores when each core gets meaningful
      work (B >= ncores * min_batch_per_core); then make grid a multiple of ncores.
    VMEM is a non-issue at these sizes (~32 KiB per batch element, double-buffered).
    """
    ncores = _num_tensorcores()
    divisors = [d for d in range(1, min(B, max_tile) + 1) if B % d == 0]
    if ncores > 1 and B >= ncores * min_batch_per_core:
        split = [d for d in divisors if (B // d) % ncores == 0]
        if split:
            return max(split)
    return max(divisors)


def gaussian_splat_predictor(point_cloud, params, n_views=1, batch_tile=None):
    """JAX wrapper reproducing GaussianSplatPredictor._forward_basic semantics
    (object-level processing + multi-view union)."""
    B, N, _ = point_cloud.shape
    assert N % 128 == 0, "point count must be a multiple of 128 (lane packing)"
    w1, b1, w2, b2 = params["w1"], params["b1"], params["w2"], params["b2"]
    H = w1.shape[1]
    f32 = jnp.float32

    tb = _pick_batch_tile(B) if batch_tile is None else batch_tile
    assert B % tb == 0, "batch_tile must divide B"
    grid = (B // tb,)
    M = tb * N

    # ---- wrapper-side layout plumbing (channel-first, batch packed on lanes) ----
    pts_cf = jnp.transpose(point_cloud, (2, 0, 1)).reshape(3, B * N).astype(f32)
    pts8 = jnp.pad(pts_cf, ((0, 8 - 3), (0, 0)))                     # (8, B*N) sublane-aligned
    w1t = jnp.transpose(w1, (1, 0)).astype(f32)                      # (H, 3)
    b1c = jnp.reshape(b1, (H, 1)).astype(f32)                        # (H, 1)
    w2_pad = jnp.pad(w2.astype(f32), ((0, 0), (0, C_PAD - C_TOTAL))) # (H, 24)
    w2t = jnp.transpose(w2_pad, (1, 0)).astype(jnp.bfloat16)         # (24, H) bf16 for the MXU
    b2c = jnp.pad(jnp.reshape(b2, (C_TOTAL, 1)).astype(f32),
                  ((0, C_PAD - C_TOTAL), (0, 0)))                    # (24, 1)

    grid_spec = pltpu.PrefetchScalarGridSpec(
        num_scalar_prefetch=0,
        grid=grid,
        in_specs=[
            pl.BlockSpec((8, M), lambda i: (0, i)),          # points, batch-on-lanes
            pl.BlockSpec((H, 3), lambda i: (0, 0)),          # w1^T   (resident)
            pl.BlockSpec((H, 1), lambda i: (0, 0)),          # b1
            pl.BlockSpec((C_PAD, H), lambda i: (0, 0)),      # w2^T (padded, bf16)
            pl.BlockSpec((C_PAD, 1), lambda i: (0, 0)),      # b2   (padded)
        ],
        out_specs=pl.BlockSpec((C_PAD, M), lambda i: (0, i)),
    )

    out_cf = pl.pallas_call(
        functools.partial(gaussian_splat_kernel, n_points=N),
        out_shape=jax.ShapeDtypeStruct((C_PAD, B * N), f32),   # fused lane-dense slab
        grid_spec=grid_spec,
        compiler_params=pltpu.CompilerParams(dimension_semantics=("parallel",)),
    )(pts8, w1t, b1c, w2t, b2c)

    # ---- channel split + re-layout in plain JAX (cheap, pure plumbing) ----
    out_nc = jnp.transpose(out_cf.reshape(C_PAD, B, N), (1, 2, 0))   # (B, N, 24)
    out_dict = {
        "xyz": out_nc[:, :, 0:3],
        "opacity": out_nc[:, :, 3:4],
        "scaling": out_nc[:, :, 4:7],
        "rotation": out_nc[:, :, 7:11],
        "features_dc": out_nc[:, :, 11:14].reshape(B, N, 1, 3),          # .unsqueeze(2)
        "features_rest": out_nc[:, :, 14:14 + SH_DIMS * 3].reshape(B, N, SH_DIMS, 3),
    }
    # _multi_view_union (N_views = 1 for the basic path)
    B_out = B // n_views
    out_dict = {k: v.reshape(B_out, n_views * v.shape[1], *v.shape[2:])
                for k, v in out_dict.items()}
    return out_dict


# ---------------- pure-JAX reference (mirrors PyTorch code path, all f32) ----------------
def reference(point_cloud, params):
    w1, b1, w2, b2 = params["w1"], params["b1"], params["w2"], params["b2"]
    hp = jax.lax.Precision.HIGHEST
    h = jnp.maximum(jnp.einsum("bnc,ch->bnh", point_cloud, w1, precision=hp) + b1, 0.0)
    feat = jnp.einsum("bnh,hc->bnc", h, w2, precision=hp) + b2          # (B, N, C)
    po = jnp.transpose(feat, (0, 2, 1))                                 # (B, C, N) torch layout
    splits = np.cumsum(SPLIT_DIMENSIONS)[:-1]
    xyz_raw, opacity, scaling, rotation, f_dc, f_rest = jnp.split(po, splits, axis=1)

    def flatten_vector(x):                                              # (B,C,N) -> (B,N,C)
        return jnp.transpose(x.reshape(x.shape[0], x.shape[1], -1), (0, 2, 1))

    pos = jnp.transpose(jnp.tanh(xyz_raw) * OFFSET_SCALE, (0, 2, 1)) + point_cloud[:, :, :3]
    norm = jnp.sqrt(jnp.sum(rotation * rotation, axis=-1, keepdims=True))
    rot = rotation / jnp.maximum(norm, 1e-6)
    out = {
        "xyz": pos,
        "opacity": flatten_vector(jax.nn.sigmoid(opacity)),
        "scaling": flatten_vector(jnp.exp(jnp.clip(scaling, -1.0, 20.0))),
        "rotation": flatten_vector(rot),
        "features_dc": flatten_vector(f_dc)[:, :, None, :],
        "features_rest": flatten_vector(f_rest).reshape(
            f_rest.shape[0], f_rest.shape[2], SH_DIMS, 3),
    }
    return out


if __name__ == "__main__":
    B, N, H = 2, 128, HIDDEN

    key = jax.random.PRNGKey(0)
    k_pts, k_w1, k_b1, k_w2, k_b2 = jax.random.split(key, 5)
    point_cloud = jax.random.normal(k_pts, (B, N, 3), jnp.float32)
    params = {
        "w1": 0.3 * jax.random.normal(k_w1, (3, H), jnp.float32),
        "b1": 0.1 * jax.random.normal(k_b1, (1, H), jnp.float32),
        "w2": 0.3 * jax.random.normal(k_w2, (H, C_TOTAL), jnp.float32),
        "b2": 0.1 * jax.random.normal(k_b2, (1, C_TOTAL), jnp.float32),
    }
    # source_cameras_view_to_world only determines B / N_views in the basic path.
    source_cameras_view_to_world = jnp.tile(jnp.eye(4, dtype=jnp.float32)[None], (B, 1, 1))

    out = gaussian_splat_predictor(point_cloud, params, n_views=1)
    out = jax.tree_util.tree_map(jax.block_until_ready, out)

    ref = reference(point_cloud, params)
    # atol sized for bf16 MXU operands with f32 accumulation vs. the all-f32 reference.
    for k in ("xyz", "opacity", "scaling", "rotation", "features_dc", "features_rest"):
        np.testing.assert_allclose(np.asarray(out[k]), np.asarray(ref[k]),
                                   rtol=2e-2, atol=1e-2)

    print("KERNEL_OK")
</pallas_src>

<mosaic_0001>
module attributes {stable_mosaic.version = 11 : i64} {
  func.func @gaussian_splat_kernel(%arg0: i32, %arg1: memref<8x256xf32, #tpu.memory_space<vmem>>, %arg2: memref<32x3xf32, #tpu.memory_space<vmem>>, %arg3: memref<32x1xf32, #tpu.memory_space<vmem>>, %arg4: memref<24x32xbf16, #tpu.memory_space<vmem>>, %arg5: memref<24x1xf32, #tpu.memory_space<vmem>>, %arg6: memref<24x256xf32, #tpu.memory_space<vmem>>) attributes {dimension_semantics = [#tpu.dimension_semantics<parallel>], iteration_bounds = array<i64: 1>, scalar_prefetch = 0 : i64, scratch_operands = 0 : i64, tpu.core_type = #tpu.core_type<tc>, window_params = [{transform_indices = @transform_0, window_bounds = array<i64: 8, 256>}, {pipeline_mode = #tpu.pipeline_mode<synchronous>, transform_indices = @transform_1, window_bounds = array<i64: 32, 3>}, {pipeline_mode = #tpu.pipeline_mode<synchronous>, transform_indices = @transform_2, window_bounds = array<i64: 32, 1>}, {pipeline_mode = #tpu.pipeline_mode<synchronous>, transform_indices = @transform_3, window_bounds = array<i64: 24, 32>}, {pipeline_mode = #tpu.pipeline_mode<synchronous>, transform_indices = @transform_4, window_bounds = array<i64: 24, 1>}, {transform_indices = @transform_5, window_bounds = array<i64: 24, 256>}]} {
    %c0 = arith.constant 0 : index
    %c0_0 = arith.constant 0 : index
    %0 = vector.load %arg1[%c0, %c0_0] : memref<8x256xf32, #tpu.memory_space<vmem>>, vector<8x256xf32>
    %c0_1 = arith.constant 0 : index
    %c0_2 = arith.constant 0 : index
    %1 = vector.load %arg2[%c0_1, %c0_2] : memref<32x3xf32, #tpu.memory_space<vmem>>, vector<32x3xf32>
    %c0_3 = arith.constant 0 : index
    %c0_4 = arith.constant 0 : index
    %2 = vector.load %arg3[%c0_3, %c0_4] : memref<32x1xf32, #tpu.memory_space<vmem>>, vector<32x1xf32>
    %c0_5 = arith.constant 0 : index
    %c0_6 = arith.constant 0 : index
    %3 = vector.load %arg4[%c0_5, %c0_6] : memref<24x32xbf16, #tpu.memory_space<vmem>>, vector<24x32xbf16>
    %c0_7 = arith.constant 0 : index
    %c0_8 = arith.constant 0 : index
    %4 = vector.load %arg5[%c0_7, %c0_8] : memref<24x1xf32, #tpu.memory_space<vmem>>, vector<24x1xf32>
    %5 = vector.extract_strided_slice %1 {offsets = [0, 0], sizes = [32, 1], strides = [1, 1]} : vector<32x3xf32> to vector<32x1xf32>
    %6 = vector.extract_strided_slice %0 {offsets = [0, 0], sizes = [1, 256], strides = [1, 1]} : vector<8x256xf32> to vector<1x256xf32>
    %7 = vector.broadcast %5 : vector<32x1xf32> to vector<32x256xf32>
    %8 = vector.broadcast %6 : vector<1x256xf32> to vector<32x256xf32>
    %9 = arith.mulf %7, %8 : vector<32x256xf32>
    %10 = vector.extract_strided_slice %1 {offsets = [0, 1], sizes = [32, 1], strides = [1, 1]} : vector<32x3xf32> to vector<32x1xf32>
    %11 = vector.extract_strided_slice %0 {offsets = [1, 0], sizes = [1, 256], strides = [1, 1]} : vector<8x256xf32> to vector<1x256xf32>
    %12 = vector.broadcast %10 : vector<32x1xf32> to vector<32x256xf32>
    %13 = vector.broadcast %11 : vector<1x256xf32> to vector<32x256xf32>
    %14 = arith.mulf %12, %13 : vector<32x256xf32>
    %15 = arith.addf %9, %14 : vector<32x256xf32>
    %16 = vector.extract_strided_slice %1 {offsets = [0, 2], sizes = [32, 1], strides = [1, 1]} : vector<32x3xf32> to vector<32x1xf32>
    %17 = vector.extract_strided_slice %0 {offsets = [2, 0], sizes = [1, 256], strides = [1, 1]} : vector<8x256xf32> to vector<1x256xf32>
    %18 = vector.broadcast %16 : vector<32x1xf32> to vector<32x256xf32>
    %19 = vector.broadcast %17 : vector<1x256xf32> to vector<32x256xf32>
    %20 = arith.mulf %18, %19 : vector<32x256xf32>
    %21 = arith.addf %15, %20 : vector<32x256xf32>
    %22 = vector.broadcast %2 : vector<32x1xf32> to vector<32x256xf32>
    %23 = arith.addf %21, %22 : vector<32x256xf32>
    %cst = arith.constant 0.000000e+00 : f32
    %24 = vector.broadcast %cst : f32 to vector<32x256xf32>
    %25 = arith.maximumf %23, %24 : vector<32x256xf32>
    %26 = arith.truncf %25 : vector<32x256xf32> to vector<32x256xbf16>
    %cst_9 = arith.constant dense<0.000000e+00> : vector<24x256xf32>
    %27 = tpu.matmul %3, %26, %cst_9 {dimension_numbers = #tpu.dot_dimension_numbers<[1], [0], [0], [1], [0, 0, 1, 1], [], []>} : vector<24x32xbf16>, vector<32x256xbf16>, vector<24x256xf32> -> vector<24x256xf32>
    %28 = vector.broadcast %4 : vector<24x1xf32> to vector<24x256xf32>
    %29 = arith.addf %27, %28 : vector<24x256xf32>
    %30 = vector.extract_strided_slice %29 {offsets = [0, 0], sizes = [24, 128], strides = [1, 1]} : vector<24x256xf32> to vector<24x128xf32>
    %31 = arith.mulf %30, %30 : vector<24x128xf32>
    %cst_10 = arith.constant dense<0.000000e+00> : vector<24xf32>
    %32 = vector.multi_reduction <add>, %31, %cst_10 [1] : vector<24x128xf32> to vector<24xf32>
    %33 = vector.shape_cast %32 : vector<24xf32> to vector<24x1xf32>
    %cst_11 = arith.constant 9.99999996E-13 : f32
    %34 = vector.broadcast %cst_11 : f32 to vector<24x1xf32>
    %35 = arith.maximumf %33, %34 : vector<24x1xf32>
    %36 = math.rsqrt %35 : vector<24x1xf32>
    %37 = vector.broadcast %36 : vector<24x1xf32> to vector<24x128xf32>
    %38 = arith.mulf %30, %37 : vector<24x128xf32>
    %39 = vector.extract_strided_slice %29 {offsets = [0, 128], sizes = [24, 128], strides = [1, 1]} : vector<24x256xf32> to vector<24x128xf32>
    %40 = arith.mulf %39, %39 : vector<24x128xf32>
    %cst_12 = arith.constant dense<0.000000e+00> : vector<24xf32>
    %41 = vector.multi_reduction <add>, %40, %cst_12 [1] : vector<24x128xf32> to vector<24xf32>
    %42 = vector.shape_cast %41 : vector<24xf32> to vector<24x1xf32>
    %cst_13 = arith.constant 9.99999996E-13 : f32
    %43 = vector.broadcast %cst_13 : f32 to vector<24x1xf32>
    %44 = arith.maximumf %42, %43 : vector<24x1xf32>
    %45 = math.rsqrt %44 : vector<24x1xf32>
    %46 = vector.broadcast %45 : vector<24x1xf32> to vector<24x128xf32>
    %47 = arith.mulf %39, %46 : vector<24x128xf32>
    %48 = tpu.concatenate %38, %47 in 1 : vector<24x128xf32>, vector<24x128xf32> -> vector<24x256xf32>
    %49 = vector.extract_strided_slice %29 {offsets = [0, 0], sizes = [8, 256], strides = [1, 1]} : vector<24x256xf32> to vector<8x256xf32>
    %50 = vector.extract_strided_slice %29 {offsets = [8, 0], sizes = [16, 256], strides = [1, 1]} : vector<24x256xf32> to vector<16x256xf32>
    %51 = tpu.iota {dimensions = array<i32: 0>} : vector<8x256xi32>
    %52 = tpu.iota {dimensions = array<i32: 0>} : vector<16x256xi32>
    %c3_i32 = arith.constant 3 : i32
    %53 = vector.broadcast %c3_i32 : i32 to vector<8x256xi32>
    %54 = arith.cmpi slt, %51, %53 : vector<8x256xi32>
    %55 = math.tanh %49 : vector<8x256xf32>
    %cst_14 = arith.constant 1.000000e-01 : f32
    %56 = vector.broadcast %cst_14 : f32 to vector<8x256xf32>
    %57 = arith.mulf %55, %56 : vector<8x256xf32>
    %58 = arith.addf %57, %0 : vector<8x256xf32>
    %c4_i32 = arith.constant 4 : i32
    %59 = vector.broadcast %c4_i32 : i32 to vector<8x256xi32>
    %60 = arith.cmpi slt, %51, %59 : vector<8x256xi32>
    %61 = arith.negf %49 : vector<8x256xf32>
    %62 = math.exp %61 : vector<8x256xf32>
    %cst_15 = arith.constant 1.000000e+00 : f32
    %63 = vector.broadcast %cst_15 : f32 to vector<8x256xf32>
    %64 = arith.addf %63, %62 : vector<8x256xf32>
    %65 = arith.divf %63, %64 : vector<8x256xf32>
    %c7_i32 = arith.constant 7 : i32
    %66 = vector.broadcast %c7_i32 : i32 to vector<8x256xi32>
    %67 = arith.cmpi slt, %51, %66 : vector<8x256xi32>
    %cst_16 = arith.constant -1.000000e+00 : f32
    %cst_17 = arith.constant 2.000000e+01 : f32
    %68 = vector.broadcast %cst_16 : f32 to vector<8x256xf32>
    %69 = arith.maximumf %68, %49 : vector<8x256xf32>
    %70 = vector.broadcast %cst_17 : f32 to vector<8x256xf32>
    %71 = arith.minimumf %70, %69 : vector<8x256xf32>
    %72 = math.exp %71 : vector<8x256xf32>
    %73 = vector.extract_strided_slice %48 {offsets = [0, 0], sizes = [8, 256], strides = [1, 1]} : vector<24x256xf32> to vector<8x256xf32>
    %74 = arith.select %67, %72, %73 : vector<8x256xi1>, vector<8x256xf32>
    %75 = arith.select %60, %65, %74 : vector<8x256xi1>, vector<8x256xf32>
    %76 = arith.select %54, %58, %75 : vector<8x256xi1>, vector<8x256xf32>
    %c3_i32_18 = arith.constant 3 : i32
    %77 = vector.broadcast %c3_i32_18 : i32 to vector<16x256xi32>
    %78 = arith.cmpi slt, %52, %77 : vector<16x256xi32>
    %79 = vector.extract_strided_slice %48 {offsets = [8, 0], sizes = [16, 256], strides = [1, 1]} : vector<24x256xf32> to vector<16x256xf32>
    %80 = arith.select %78, %79, %50 : vector<16x256xi1>, vector<16x256xf32>
    %81 = tpu.concatenate %76, %80 in 0 : vector<8x256xf32>, vector<16x256xf32> -> vector<24x256xf32>
    %c0_19 = arith.constant 0 : index
    %c0_20 = arith.constant 0 : index
    %82 = vector.load %arg6[%c0_19, %c0_20] : memref<24x256xf32, #tpu.memory_space<vmem>>, vector<24x256xf32>
    tpu.vector_store %arg6[%c0_19, %c0_20], %81 {strides = array<i32>} : memref<24x256xf32, #tpu.memory_space<vmem>>, vector<24x256xf32>,
    return
  }
  func.func @transform_0(%arg0: i32) -> (i32, i32) {
    %c0_i32 = arith.constant 0 : i32
    %c0_i32_0 = arith.constant 0 : i32
    return %c0_i32, %arg0 : i32, i32
  }
  func.func @transform_1(%arg0: i32) -> (i32, i32) {
    %c0_i32 = arith.constant 0 : i32
    %c0_i32_0 = arith.constant 0 : i32
    %c0_i32_1 = arith.constant 0 : i32
    return %c0_i32, %c0_i32_0 : i32, i32
  }
  func.func @transform_2(%arg0: i32) -> (i32, i32) {
    %c0_i32 = arith.constant 0 : i32
    %c0_i32_0 = arith.constant 0 : i32
    %c0_i32_1 = arith.constant 0 : i32
    return %c0_i32, %c0_i32_0 : i32, i32
  }
  func.func @transform_3(%arg0: i32) -> (i32, i32) {
    %c0_i32 = arith.constant 0 : i32
    %c0_i32_0 = arith.constant 0 : i32
    %c0_i32_1 = arith.constant 0 : i32
    return %c0_i32, %c0_i32_0 : i32, i32
  }
  func.func @transform_4(%arg0: i32) -> (i32, i32) {
    %c0_i32 = arith.constant 0 : i32
    %c0_i32_0 = arith.constant 0 : i32
    %c0_i32_1 = arith.constant 0 : i32
    return %c0_i32, %c0_i32_0 : i32, i32
  }
  func.func @transform_5(%arg0: i32) -> (i32, i32) {
    %c0_i32 = arith.constant 0 : i32
    %c0_i32_0 = arith.constant 0 : i32
    return %c0_i32, %arg0 : i32, i32
  }
}

</mosaic_0001>

<bundles_post_ra>
// kernel: tpu_custom_call.1
= control target key start
LH: loop header
LB: loop body
LE: loop exit
PB: predicated region body
PF: predicated region fallthrough
CT: control target
= control target key end

     0   :  { %v506_v2 = vmov 1   ;;  %s747_s0 = inlined_call_operand.vmem [shape: f32[8,256], index: 0, kind: input, shape index: {}]   ;;  %s748_s1 = inlined_call_operand.vmem [shape: f32[32,3], index: 1, kind: input, shape index: {}]   ;;  %s749_s2 = inlined_call_operand.vmem [shape: f32[32,1], index: 2, kind: input, shape index: {}]   ;;  %s750_s3 = inlined_call_operand.vmem [shape: bf16[24,32], index: 3, kind: input, shape index: {}]   ;;  %s751_s4 = inlined_call_operand.vmem [shape: f32[24,1], index: 4, kind: input, shape index: {}]   ;;  %s752_s5 = inlined_call_operand.hbm [shape: f32[24,256], index: 5, kind: output, shape index: {}]  }
   0x1   :  { %v26_v0 = vld [vmem:[%s748_s1 + $0x10] sm:$0xff]  ;;  %v25_v1 = vld [vmem:[%s748_s1 + $0x8] sm:$0xff]  ;;  %450 = vset.pattern.permute.xlu0 %v506_v2  ;;  %446 = vset.pattern.permute.xlu1 %v506_v2 }
   0x2   :  { %10 = vsyncpa [#allocation3], 0  ;;  %77 = vperm.xlu1 %446, %v26_v0   ;;  %73 = vperm.xlu0 %450, %v25_v1   ;;  %v507_v3 = vmov 2   ;;  %v27_v4 = vld [vmem:[%s748_s1 + $0x18] sm:$0xff]  ;;  %v508_v5 = vmov 0   ;;  %v24_v6 = vld [vmem:[%s748_s1] sm:$0xff] }
   0x3   :  { %447 = vset.pattern.permute.xlu2 %v507_v3  ;;  %v28_v7 = vld [vmem:[%s749_s2] sm:$0xff]  ;;  %v30_v8 = vld [vmem:[%s749_s2 + $0x10] sm:$0xff]  ;;  %v31_v9 = vld [vmem:[%s749_s2 + $0x18] sm:$0xff]  ;;  %vm199_vm0 = vcmask 261120   ;;  %s413_s22 = sshll.u32 %s752_s5, 4  ;;  %s510_s5 = smov 256   ;;  %s414_s22 = int_to_ptr.hbm [resolvable:$true] %s413_s22 }
   0x4   :  { %111 = vperm.xlu2 %447, %v26_v0   ;;  %v29_v10 = vld [vmem:[%s749_s2 + $0x8] sm:$0xff]  ;;  %v35_v11 = vld [vmem:[%s751_s4] sm:$0xff]  ;;  %s511_s23 = smov 16  }
   0x5   :  { %v36_v12 = vld [vmem:[%s751_s4 + $0x8] sm:$0xff]  ;;  %v575_v21 = vld [vmem:[%s747_s0] sm:$0xff] }
   0x6   :  { %v580_v22 = vld [vmem:[%s747_s0 + $0x8] sm:$0xff]  ;;  %v58_v24 = vperm.slane %v575_v21, 0  ;;  %v84_v27 = vperm.slane %v575_v21, 1  ;;  %v118_v31 = vperm.slane %v575_v21, 2 }
   0x7   :  { %v59_v25 = vperm.slane %v580_v22, 0  ;;  %v85_v28 = vperm.slane %v580_v22, 1  ;;  %v119_v32 = vperm.slane %v580_v22, 2 }
   0xa   :  { %81 = vperm.xlu1 %446, %v27_v4   ;;  %451 = vset.pattern.permute.xlu0 %v508_v5 }
   0xb   :  { %50 = vperm.xlu0 %451, %v26_v0  }
   0xc   :  { %115 = vperm.xlu2 %447, %v27_v4  }
  0x12   :  { %448 = vset.pattern.permute.xlu1 %v508_v5 }
  0x13   :  { %55 = vperm.xlu0 %451, %v27_v4   ;;  %45 = vperm.xlu1 %448, %v25_v1  }
  0x14   :  { %449 = vset.pattern.permute.xlu2 %v506_v2 }
  0x15   :  { %69 = vperm.xlu2 %449, %v24_v6  }
  0x1b   :  { %452 = vset.pattern.permute.xlu1 %v507_v3  ;;  %40 = vperm.xlu0 %451, %v24_v6  }
  0x1c   :  { %103 = vperm.xlu1 %452, %v24_v6  }
  0x1d   :  { %453 = vset.pattern.permute.xlu2 %v507_v3 }
  0x1e   :  { %107 = vperm.xlu2 %453, %v25_v1  }
  0x23   :  { %138 = vperm.xlu0 %451, %v28_v7  }
  0x24   :  { %454 = vset.pattern.permute.xlu1 %v508_v5 }
  0x25   :  { %148 = vperm.xlu1 %454, %v30_v8  }
  0x26   :  { %455 = vset.pattern.permute.xlu2 %v508_v5 }
  0x27   :  { %153 = vperm.xlu2 %455, %v31_v9  }
  0x2d   :  { %143 = vperm.xlu1 %454, %v29_v10  }
  0x2f   :  { %178 = vperm.xlu2 %455, %v35_v11  }
  0x35   :  { %183 = vperm.xlu1 %454, %v36_v12  }
  0x5e   :  { %v112_v13 = vpop.permute.xlu2 %111 }
  0x5f   :  { %v124_v50 = vmul.f32 %v118_v31, %v112_v13  ;;  %v125_v51 = vmul.f32 %v119_v32, %v112_v13 }
  0x66   :  { %v116_v16 = vpop.permute.xlu2 %115 }
  0x67   :  { %v126_v40 = vmul.f32 %v118_v31, %v116_v16  ;;  %v127_v41 = vmul.f32 %v119_v32, %v116_v16 }
  0x6f   :  { %v70_v19 = vpop.permute.xlu2 %69 }
  0x70   :  { %v86_v54 = vmul.f32 %v84_v27, %v70_v19  ;;  %v87_v55 = vmul.f32 %v85_v28, %v70_v19 }
  0x74   :  { %v78_v14 = vpop.permute.xlu1 %77  ;;  %v74_v15 = vpop.permute.xlu0 %73 }
  0x75   :  { %v90_v42 = vmul.f32 %v84_v27, %v78_v14  ;;  %v91_v43 = vmul.f32 %v85_v28, %v78_v14  ;;  %v88_v62 = vmul.f32 %v84_v27, %v74_v15  ;;  %v89_v63 = vmul.f32 %v85_v28, %v74_v15 }
  0x78   :  { %v108_v26 = vpop.permute.xlu2 %107 }
  0x79   :  { %v122_v7 = vmul.f32 %v118_v31, %v108_v26  ;;  %v123_v8 = vmul.f32 %v119_v32, %v108_v26 }
  0x7c   :  { %v82_v17 = vpop.permute.xlu1 %81 }
  0x7d   :  { %v51_v18 = vpop.permute.xlu0 %50  ;;  %v92_v33 = vmul.f32 %v84_v27, %v82_v17  ;;  %v93_v34 = vmul.f32 %v85_v28, %v82_v17 }
  0x7e   :  { %v64_v35 = vmul.f32 %v58_v24, %v51_v18  ;;  %v65_v36 = vmul.f32 %v59_v25, %v51_v18 }
  0x80   :  { %v98_v45 = vadd.f32 %v90_v42, %v64_v35  ;;  %v99_v46 = vadd.f32 %v91_v43, %v65_v36  ;;  %v435_v35 = vld [vmem:[%s750_s3] sm:$0xff]  ;;  %v34_v36 = vld [vmem:[%s750_s3 + $0x8] sm:$0xf] }
  0x81   :  { %v154_v49 = vpop.permute.xlu2 %153 }
  0x82   :  { %v132_v60 = vadd.f32 %v124_v50, %v98_v45  ;;  %v133_v61 = vadd.f32 %v125_v51, %v99_v46 }
  0x85   :  { %v46_v20 = vpop.permute.xlu1 %45  ;;  %v56_v23 = vpop.permute.xlu0 %55 }
  0x86   :  { %v66_v29 = vmul.f32 %v58_v24, %v56_v23  ;;  %v67_v30 = vmul.f32 %v59_v25, %v56_v23  ;;  %v62_v56 = vmul.f32 %v58_v24, %v46_v20  ;;  %v63_v57 = vmul.f32 %v59_v25, %v46_v20 }
  0x88   :  { %v100_v37 = vadd.f32 %v92_v33, %v66_v29  ;;  %v101_v38 = vadd.f32 %v93_v34, %v67_v30  ;;  %v96_v9 = vadd.f32 %v88_v62, %v62_v56  ;;  %v97_v10 = vadd.f32 %v89_v63, %v63_v57 }
  0x8a   :  { %v134_v47 = vadd.f32 %v126_v40, %v100_v37  ;;  %v135_v48 = vadd.f32 %v127_v41, %v101_v38  ;;  %v130_v20 = vadd.f32 %v122_v7, %v96_v9  ;;  %v196_v37 = vunpack.c.l.b16 %v34_v36 }
  0x8c   :  { %v162_v58 = vadd.f32 %v154_v49, %v134_v47  ;;  %v163_v59 = vadd.f32 %v154_v49, %v135_v48  ;;  %v198_v38 = vpack.c.b16 %v196_v37, %v196_v37 }
  0x8d   :  { %v41_v44 = vpop.permute.xlu0 %40 }
  0x8e   :  { %v104_v39 = vpop.permute.xlu1 %103  ;;  %v60_v52 = vmul.f32 %v58_v24, %v41_v44  ;;  %v61_v53 = vmul.f32 %v59_v25, %v41_v44  ;;  %v170_v11 = vmax.f32 %v162_v58, 0.0  ;;  %v171_v12 = vmax.f32 %v163_v59, 0.0 }
  0x8f   :  { %v120_v0 = vmul.f32 %v118_v31, %v104_v39  ;;  %v121_v1 = vmul.f32 %v119_v32, %v104_v39  ;;  %v131_v25 = vadd.f32 %v123_v8, %v97_v10  ;;  %v179_v39 = vpop.permute.xlu2 %178 }
  0x90   :  { %v94_v3 = vadd.f32 %v86_v54, %v60_v52  ;;  %v95_v4 = vadd.f32 %v87_v55, %v61_v53  ;;  %v37_v53 = vld [vmem:[%s751_s4 + $0x10] sm:$0xff]  ;;  %s509_s4 = smov [#allocation2]  }
  0x91   :  { %s411_s19 = sshll.u32 %s509_s4, 4  ;;  %s412_s19 = int_to_ptr.vmem [resolvable:$true] %s411_s19 }
  0x92   :  { %v128_v17 = vadd.f32 %v120_v0, %v94_v3  ;;  %v129_v18 = vadd.f32 %v121_v1, %v95_v4 }
  0x95   :  { %v139_v16 = vpop.permute.xlu0 %138 }
  0x96   :  { %v156_v23 = vadd.f32 %v139_v16, %v128_v17  ;;  %v157_v24 = vadd.f32 %v139_v16, %v129_v18 }
  0x97   :  { %v149_v2 = vpop.permute.xlu1 %148 }
  0x98   :  { %v160_v5 = vadd.f32 %v149_v2, %v132_v60  ;;  %v161_v6 = vadd.f32 %v149_v2, %v133_v61  ;;  %v164_v29 = vmax.f32 %v156_v23, 0.0  ;;  %v165_v30 = vmax.f32 %v157_v24, 0.0 }
  0x9a   :  { %v168_v13 = vmax.f32 %v160_v5, 0.0  ;;  %v169_v14 = vmax.f32 %v161_v6, 0.0 }
  0x9c   :  { %v174_v19 = vpack.c.bf16 %v170_v11, %v168_v13  ;;  %v175_v15 = vpack.c.bf16 %v171_v12, %v169_v14  ;;  %v332_v13 = vlaneseq }
  0x9e   :  { %212 = vmatpush.bf16.msra.mxu0 %v174_v19  ;;  %436 = vmatpush.bf16.msra.mxu2 %v174_v19 }
  0x9f   :  { %230 = vmatpush.bf16.msra.mxu1 %v175_v15  ;;  %438 = vmatpush.bf16.msra.mxu3 %v175_v15  ;;  %v144_v26 = vpop.permute.xlu1 %143  ;;  %v643_v15 = vshrl.u32 %v332_v13, 7 }
  0xa0   :  { %v158_v27 = vadd.f32 %v144_v26, %v130_v20  ;;  %v159_v28 = vadd.f32 %v144_v26, %v131_v25 }
  0xa1   :  { %vm381_vm1 = vcmp.lt.s32.totalorder %v643_v15, 7  ;;  %vm342_vm2 = vcmp.lt.s32.totalorder %v643_v15, 4 }
  0xa2   :  { %v166_v31 = vmax.f32 %v158_v27, 0.0  ;;  %v167_v32 = vmax.f32 %v159_v28, 0.0 }
  0xa4   :  { %v172_v33 = vpack.c.bf16 %v166_v31, %v164_v29  ;;  %v173_v34 = vpack.c.bf16 %v167_v32, %v165_v30 }
  0xa6   :  { %213 = vmatpush.bf16.msra.mxu0 %v172_v33  ;;  %437 = vmatpush.bf16.msra.mxu2 %v172_v33 }
  0xa7   :  { %231 = vmatpush.bf16.msra.mxu1 %v173_v34  ;;  %439 = vmatpush.bf16.msra.mxu3 %v173_v34  ;;  %v184_v46 = vpop.permute.xlu1 %183 }
  0xa9   :  { %429 = vmatmul.msk.bf16.vlgmr.msra.gmra.mxu0 %vm199_vm0, %v435_v35  ;;  %430 = vmatmul.msk.bf16.vlgmr.msra.gmra.mxu2 %vm199_vm0, %v198_v38 }
  0xaa   :  { %431 = vmatmul.msk.bf16.vlgmr.msra.gmra.mxu1 %vm199_vm0, %v435_v35  ;;  %432 = vmatmul.msk.bf16.vlgmr.msra.gmra.mxu3 %vm199_vm0, %v198_v38 }
 0x126   :  { %v215_v40 = vpop.f32.mrf.mxu0 }
 0x127   :  { %v594_v41 = vadd.f32 %v215_v40, %v179_v39  ;;  %v233_v42 = vpop.f32.mrf.mxu1 }
 0x128   :  { %v596_v43 = vadd.f32 %v233_v42, %v179_v39 }
 0x129   :  { %v242_v44 = vmul.f32 %v594_v41, %v594_v41  ;;  %v433_v54 = vmul.f32 -1.442695, %v594_v41  ;;  %v382_v0 = vmax.f32 %v594_v41, -1.0 }
 0x12a   :  { %v287_v45 = vmul.f32 %v596_v43, %v596_v43  ;;  %v434_v55 = vmul.f32 -1.442695, %v596_v43  ;;  %v383_v1 = vmax.f32 %v596_v43, -1.0 }
 0x12b   :  { %245 = vadd.xlane.f32.xlu2 %v242_v44  ;;  %456 = vpow2.f32 %v433_v54  ;;  %v384_v5 = vmin.f32 %v382_v0, 20.0 }
 0x12c   :  { %290 = vadd.xlane.f32.xlu0 %v287_v45  ;;  %458 = vpow2.f32 %v434_v55  ;;  %v615_v56 = vpop.f32.mrf.mxu2  ;;  %v385_v8 = vmin.f32 %v383_v1, 20.0 }
 0x12d   :  { %v617_v57 = vpop.f32.mrf.mxu3  ;;  %v386_v14 = vmul.f32 1.442695, %v384_v5 }
 0x12e   :  { %v217_v47 = vpop.f32.mrf.mxu0  ;;  %v388_v17 = vmul.f32 1.442695, %v385_v8 }
 0x12f   :  { %v602_v48 = vadd.f32 %v217_v47, %v184_v46  ;;  %v235_v49 = vpop.f32.mrf.mxu1 }
 0x130   :  { %v604_v50 = vadd.f32 %v235_v49, %v184_v46 }
 0x131   :  { %v243_v51 = vmul.f32 %v602_v48, %v602_v48  ;;  %v457_v58 = vpop.eup %456 }
 0x132   :  { %v288_v52 = vmul.f32 %v604_v50, %v604_v50  ;;  %v459_v59 = vpop.eup %458  ;;  %v619_v60 = vadd.f32 1.0, %v457_v58 }
 0x133   :  { %247 = vadd.xlane.f32.xlu1 %v243_v51  ;;  %v621_v61 = vadd.f32 1.0, %v459_v59 }
 0x134   :  { %292 = vadd.xlane.f32.xlu2 %v288_v52  ;;  %v222_v62 = vpop.f32.mrf.mxu2  ;;  %460 = vrcp.f32 %v619_v60  ;;  %v360_v37 = vand.u32 2147483647, %v619_v60  ;;  %v362_v38 = vand.u32 2147483648, %v619_v60  ;;  %vm356_vm4 = vweird.f32 %v619_v60 }
 0x135   :  { %v240_v63 = vpop.f32.mrf.mxu3  ;;  %462 = vrcp.f32 %v621_v61  ;;  %vm371_vm3 = vweird.f32 %v621_v61  ;;  %v377_v42 = vand.u32 2147483648, %v621_v61 }
 0x136   :  { %464 = vtanh.f32 %v594_v41  ;;  %vm686_vm10 = vcmp.eq.f32.partialorder %v360_v37, 8.507059e+37  ;;  %v363_v55 = vor.u32 1.1754944e-38, %v362_v38 }
 0x137   :  { %466 = vtanh.f32 %v596_v43  ;;  %v378_v8 = vor.u32 1.1754944e-38, %v377_v42 }
 0x13a   :  { %v628_v2 = vpop.eup %460 }
 0x13b   :  { %v631_v4 = vpop.eup %462  ;;  %v352_v11 = vmul.f32 %v628_v2, %v619_v60  ;;  %vm357_vm5 = vweird.f32 %v628_v2 }
 0x13c   :  { %v465_v10 = vpop.eup %464  ;;  %v367_v12 = vmul.f32 %v631_v4, %v621_v61  ;;  %vm372_vm6 = vweird.f32 %v631_v4  ;;  %vm682_vm9 = vmor %vm356_vm4, %vm357_vm5 }
 0x13d   :  { %v467_v16 = vpop.eup %466  ;;  %v338_v18 = vmul.f32 0.1, %v465_v10  ;;  %v353_v19 = vsub.f32 1.0, %v352_v11  ;;  %vm694_vm11 = vmor %vm371_vm3, %vm372_vm6  ;;  %vm335_vm3 = vcmp.lt.s32.totalorder %v643_v15, 3 }
 0x13e   :  { %v368_v20 = vsub.f32 1.0, %v367_v12  ;;  %v339_v25 = vmul.f32 0.1, %v467_v16 }
 0x13f   :  { %v654_v31 = vadd.f32 %v338_v18, %v575_v21  ;;  %v354_v34 = vmul.f32 %v628_v2, %v353_v19 }
 0x140   :  { %v369_v33 = vmul.f32 %v631_v4, %v368_v20  ;;  %v664_v36 = vadd.f32 %v339_v25, %v580_v22  ;;  %v375_v22 = vand.u32 2147483647, %v621_v61 }
 0x141   :  { %v355_v47 = vadd.f32 %v628_v2, %v354_v34 }
 0x142   :  { %v370_v46 = vadd.f32 %v631_v4, %v369_v33  ;;  %vm376_vm0 = vcmp.eq.f32.partialorder %v375_v22, 8.507059e+37 }
 0x144   :  { %v374_v5 = vsel %vm694_vm11, %v631_v4, %v370_v46 }
 0x145   :  { %v379_v12 = vsel %vm376_vm0, %v378_v8, %v374_v5 }
 0x14c   :  { %188 = vperm.xlu2 %455, %v37_v53  }
 0x19e   :  { %v246_v3 = vpop.xlane.xlu2 %245 }
 0x19f   :  { %v291_v6 = vpop.xlane.xlu0 %290  ;;  %v633_v7 = vmax.f32 %v246_v3, 1e-12 }
 0x1a0   :  { %v635_v9 = vmax.f32 %v291_v6, 1e-12 }
 0x1a1   :  { %468 = vrsqrt.f32 %v633_v7  ;;  %vm260_vm12 = vweird.f32 %v633_v7 }
 0x1a2   :  { %470 = vrsqrt.f32 %v635_v9  ;;  %vm305_vm13 = vweird.f32 %v635_v9 }
 0x1a3   :  { %472 = vpow2.f32 %v386_v14 }
 0x1a4   :  { %474 = vpow2.f32 %v388_v17 }
 0x1a6   :  { %v248_v23 = vpop.xlane.xlu1 %247 }
 0x1a7   :  { %v645_v24 = vpop.eup %468  ;;  %v647_v26 = vmax.f32 %v248_v23, 1e-12  ;;  %v293_v27 = vpop.xlane.xlu2 %292 }
 0x1a8   :  { %v471_v28 = vpop.eup %470  ;;  %v255_v29 = vmul.f32 %v645_v24, %v633_v7  ;;  %v651_v30 = vmax.f32 %v293_v27, 1e-12  ;;  %vm261_vm7 = vweird.f32 %v645_v24 }
 0x1a9   :  { %v300_v32 = vmul.f32 %v471_v28, %v635_v9  ;;  %476 = vrsqrt.f32 %v647_v26  ;;  %v473_v40 = vpop.eup %472  ;;  %vm306_vm8 = vweird.f32 %v471_v28  ;;  %vm262_vm14 = vmor %vm260_vm12, %vm261_vm7 }
 0x1aa   :  { %v256_v35 = vmul.f32 %v645_v24, %v255_v29  ;;  %478 = vrsqrt.f32 %v651_v30  ;;  %v475_v45 = vpop.eup %474  ;;  %vm307_vm15 = vmor %vm305_vm13, %vm306_vm8  ;;  %vm315_vm7 = vweird.f32 %v651_v30 }
 0x1ab   :  { %v301_v21 = vmul.f32 %v471_v28, %v300_v32 }
 0x1ac   :  { %v257_v39 = vmul.f32 0.5, %v256_v35 }
 0x1ad   :  { %v302_v44 = vmul.f32 0.5, %v301_v21 }
 0x1ae   :  { %v258_v49 = vsub.f32 1.5, %v257_v39 }
 0x1af   :  { %v477_v51 = vpop.eup %476  ;;  %v303_v52 = vsub.f32 1.5, %v302_v44  ;;  %v189_v58 = vpop.permute.xlu2 %188 }
 0x1b0   :  { %v479_v59 = vpop.eup %478  ;;  %v259_v60 = vmul.f32 %v645_v24, %v258_v49  ;;  %v265_v63 = vmul.f32 %v477_v51, %v647_v26  ;;  %v221_v0 = vadd.f32 %v615_v56, %v189_v58  ;;  %v239_v3 = vadd.f32 %v617_v57, %v189_v58 }
 0x1b1   :  { %v304_v1 = vmul.f32 %v471_v28, %v303_v52  ;;  %v310_v61 = vmul.f32 %v479_v59, %v651_v30  ;;  %v359_v56 = vsel %vm682_vm9, %v628_v2, %v355_v47  ;;  %vm271_vm4 = vweird.f32 %v477_v51 }
 0x1b2   :  { %v263_v6 = vsel %vm262_vm14, %v645_v24, %v259_v60  ;;  %v266_v7 = vmul.f32 %v477_v51, %v265_v63  ;;  %405 = vst [vmem:[#allocation2 + $0x20] sm:$0xff] %v221_v0  ;;  %v364_v2 = vsel %vm686_vm10, %v363_v55, %v359_v56  ;;  %vm316_vm5 = vweird.f32 %v479_v59 }
 0x1b3   :  { %v308_v9 = vsel %vm307_vm15, %v471_v28, %v304_v1  ;;  %v284_v10 = vmul.f32 %v263_v6, %v594_v41  ;;  %v311_v11 = vmul.f32 %v479_v59, %v310_v61  ;;  %406 = vst [vmem:[#allocation2 + $0x28] sm:$0xff] %v239_v3 }
 0x1b4   :  { %v329_v57 = vmul.f32 %v308_v9, %v596_v43  ;;  %v267_v4 = vmul.f32 0.5, %v266_v7 }
 0x1b5   :  { %v390_v13 = vsel %vm381_vm1, %v473_v40, %v284_v10  ;;  %v312_v14 = vmul.f32 0.5, %v311_v11 }
 0x1b6   :  { %v391_v16 = vsel %vm381_vm1, %v475_v45, %v329_v57  ;;  %v392_v41 = vsel %vm342_vm2, %v364_v2, %v390_v13  ;;  %v268_v17 = vsub.f32 1.5, %v267_v4  ;;  %vm270_vm1 = vweird.f32 %v647_v26 }
 0x1b7   :  { %v393_v43 = vsel %vm342_vm2, %v379_v12, %v391_v16  ;;  %v394_v18 = vsel %vm335_vm3, %v654_v31, %v392_v41  ;;  %v313_v19 = vsub.f32 1.5, %v312_v14  ;;  %vm272_vm6 = vmor %vm270_vm1, %vm271_vm4 }
 0x1b8   :  { %v395_v20 = vsel %vm335_vm3, %v664_v36, %v393_v43  ;;  %v269_v23 = vmul.f32 %v477_v51, %v268_v17  ;;  %401 = vst [vmem:[#allocation2] sm:$0xff] %v394_v18  ;;  %vm317_vm2 = vmor %vm315_vm7, %vm316_vm5 }
 0x1b9   :  { %402 = vst [vmem:[#allocation2 + $0x8] sm:$0xff] %v395_v20  ;;  %v314_v24 = vmul.f32 %v479_v59, %v313_v19 }
 0x1ba   :  { %v273_v25 = vsel %vm272_vm6, %v477_v51, %v269_v23 }
 0x1bb   :  { %v285_v27 = vmul.f32 %v273_v25, %v602_v48  ;;  %v318_v28 = vsel %vm317_vm2, %v479_v59, %v314_v24 }
 0x1bc   :  { %v330_v29 = vmul.f32 %v318_v28, %v604_v50 }
 0x1bd   :  { %v397_v26 = vsel %vm335_vm3, %v285_v27, %v602_v48 }
 0x1be   :  { %403 = vst [vmem:[#allocation2 + $0x10] sm:$0xff] %v397_v26  ;;  %v398_v30 = vsel %vm335_vm3, %v330_v29, %v604_v50 }
 0x1bf   :  { %404 = vst [vmem:[#allocation2 + $0x18] sm:$0xff] %v398_v30 }
 0x1c0   :  { %419 = dma.vmem_to_hbm [thread:$0]  %s412_s19, 768, %s414_s22, [#allocation3], %s510_s5, %s510_s5, %s511_s23  }
 0x1c1   :  { %504 = dma.done.wait [#allocation3], 768  }
 0x1c2   :  { %505 = vsyncadd [#allocation3], 4294966528 }
 0x1c3   :  { %424 = vsyncpa [#allocation3], 1 }

</bundles_post_ra>
